<compile_context>
chip_gen: v7x
topology: tpu7x:2x2x1
jax: 0.10.0
libtpu: 0.0.40
codegen_flags: <defaults>
</compile_context>

<pallas_src>
import functools

import jax
import jax.numpy as jnp
import numpy as np
from jax.experimental import pallas as pl
from jax.experimental.pallas import tpu as pltpu

_LANE = 128
_SUBLANE = 8
_STAGE_BUDGET_BYTES = 2 * 1024 * 1024   # input-block + output-block bytes per pipeline stage
_MIN_GRID_STEPS = 8                     # >= 4 steps per core on dual-TensorCore chips (v7x)


def _round_up(v, m):
    return -(-v // m) * m


def _replication_matrix(w, stride):
    """(Wp, stride*stride*w) f32 0/1 matrix R with R[v, j*w*stride + v*stride + k] = 1.

    Row v scatters input column v to every output column it replicates to.
    Rows w..Wp-1 are zero so the MXU contraction runs over a lane-aligned
    (multiple-of-128) dimension with explicit zeros, never padding garbage.
    """
    wp = _round_up(w, _LANE)
    wo = w * stride
    cols = np.arange(stride * stride * w)
    src = (cols % wo) // stride                      # input column feeding each output column
    r = (src[None, :] == np.arange(wp)[:, None]).astype(np.float32)
    return jnp.asarray(r)


def _upsample_kernel(x_ref, r_ref, o_ref):
    """x_ref: (TN, W).  r_ref: (Wp, s*s*W) 0/1 selection.  o_ref: (TN, s*s*W).

    o[t, j*W*s + w*s + k] = x[t, w]  for all j, k in [0, s).

    The replication (a lane-axis interleave) is one MXU matmul with a 0/1
    selection matrix, so no VPU/XLU relayouts are needed and the store is one
    full-width block store.  x is split into three bf16-exact terms so every
    MXU product is a multiply of exactly-representable values -> the copy is
    bit-exact for normal floats under any MXU f32-emulation mode.
    """
    tn, w = x_ref.shape
    wp = r_ref.shape[0]

    r = r_ref[...]
    x = x_ref[...].astype(jnp.float32)
    if wp > w:  # zero-pad the contraction dim to the lane-aligned width of R
        x = jnp.concatenate([x, jnp.zeros((tn, wp - w), jnp.float32)], axis=-1)

    x1 = x.astype(jnp.bfloat16).astype(jnp.float32)
    rem = x - x1
    x2 = rem.astype(jnp.bfloat16).astype(jnp.float32)
    x3 = rem - x2                                    # exactly bf16-representable

    y = jnp.dot(x1, r, preferred_element_type=jnp.float32)
    y += jnp.dot(x2, r, preferred_element_type=jnp.float32)
    y += jnp.dot(x3, r, preferred_element_type=jnp.float32)
    o_ref[...] = y.astype(o_ref.dtype)


def _rows_per_block(n_rows, w_in, w_out, itemsize):
    """Input rows per grid step: ~1 MiB in + ~1 MiB out per stage, >= 8 steps."""
    in_row = _round_up(w_in, _LANE) * itemsize       # padded VMEM bytes per input row
    out_row = _round_up(w_out, _LANE) * itemsize     # padded VMEM bytes per output row
    tn = max(_SUBLANE, _STAGE_BUDGET_BYTES // (in_row + out_row))
    tn = min(tn, _round_up(pl.cdiv(n_rows, _MIN_GRID_STEPS), _SUBLANE))
    if tn >= n_rows:
        return n_rows
    return max(_SUBLANE, (tn // _SUBLANE) * _SUBLANE)


@functools.lru_cache(maxsize=None)
def _vmem_limit_bytes():
    # Derive from the chip (64 MiB/TC on v7x, 128 MiB on v5e/v6e) instead of
    # hard-coding; the blocks above only need a few MiB, so stay well under.
    try:
        cap = int(pltpu.get_tpu_info().vmem_capacity_bytes)
        return max(16 * 1024 * 1024, min(cap // 2, 64 * 1024 * 1024))
    except Exception:
        return 32 * 1024 * 1024


@functools.partial(jax.jit, static_argnums=(1, 2))
def _upsample_pallas(x, stride, dimension_semantics):
    B, C, H, W = x.shape
    s = int(stride)
    n_rows = B * C * H
    out_lanes = s * s * W                      # one input row -> s output rows of W*s

    x2 = x.reshape(n_rows, W)                  # free row-major view (no transpose)
    r = _replication_matrix(W, s)              # (Wp, out_lanes) constant, fetched once

    tn = _rows_per_block(n_rows, W, out_lanes, x.dtype.itemsize)

    out2 = pl.pallas_call(
        _upsample_kernel,
        out_shape=jax.ShapeDtypeStruct((n_rows, out_lanes), x.dtype),
        grid_spec=pltpu.PrefetchScalarGridSpec(
            num_scalar_prefetch=0,
            grid=(pl.cdiv(n_rows, tn),),
            in_specs=[
                pl.BlockSpec((tn, W), lambda i: (i, 0)),
                # constant block index -> DMA'd once, reused by every grid step
                pl.BlockSpec(r.shape, lambda i: (0, 0)),
            ],
            out_specs=pl.BlockSpec((tn, out_lanes), lambda i: (i, 0)),
        ),
        compiler_params=pltpu.CompilerParams(
            dimension_semantics=dimension_semantics,
            vmem_limit_bytes=_vmem_limit_bytes(),
        ),
    )(x2, r)

    # (n_rows, s*s*W) row-major is bit-identical to (B, C, H*s, W*s) row-major.
    return out2.reshape(B, C, H * s, W * s)


def _upsample_ref(x, stride):
    """Pure-JAX reference mirroring the PyTorch view/expand/view."""
    B, C, H, W = x.shape
    return jnp.broadcast_to(
        x[:, :, :, None, :, None], (B, C, H, stride, W, stride)
    ).reshape(B, C, H * stride, W * stride)


_SEMANTICS = None


def _pick_dimension_semantics():
    """Prefer CORE_PARALLEL on the row-block axis (shards it across both v7x
    TensorCores); fall back to 'parallel'/'arbitrary' if the runtime rejects it.
    Each candidate is probed once on a tiny input and validated bit-exactly."""
    global _SEMANTICS
    if _SEMANTICS is not None:
        return _SEMANTICS

    candidates = []
    core_parallel = getattr(pltpu, "CORE_PARALLEL", None)
    if core_parallel is not None:
        candidates.append((core_parallel,))
    candidates += [("parallel",), ("arbitrary",)]

    probe = jnp.arange(2 * 3 * 8 * 8, dtype=jnp.float32).reshape(2, 3, 8, 8)
    want = _upsample_ref(probe, 2)
    for sem in candidates:
        try:
            got = jax.block_until_ready(_upsample_pallas(probe, 2, sem))
            if bool(jnp.array_equal(got, want)):
                _SEMANTICS = sem
                return sem
        except Exception:
            continue
    _SEMANTICS = ("arbitrary",)
    return _SEMANTICS


def upsample(x, stride=2):
    """Darknet `Upsample`: nearest-neighbor upsample of an NCHW tensor by `stride`."""
    assert x.ndim == 4
    assert jnp.issubdtype(x.dtype, jnp.floating), "float feature maps expected"
    return _upsample_pallas(x, int(stride), _pick_dimension_semantics())


if __name__ == "__main__":
    key = jax.random.PRNGKey(0)
    B, C, H, W = 2, 4, 16, 16
    stride = 2
    x = jax.random.normal(key, (B, C, H, W), dtype=jnp.float32)

    out = jax.block_until_ready(upsample(x, stride=stride))
    ref = _upsample_ref(x, stride)

    assert out.shape == (B, C, H * stride, W * stride)
    assert out.dtype == x.dtype
    assert jnp.array_equal(out, ref), "upsample mismatch"
    print("KERNEL_OK")
</pallas_src>

<mosaic_0001>
module attributes {stable_mosaic.version = 11 : i64} {
  func.func @_upsample_kernel(%arg0: i32, %arg1: memref<8x8xf32, #tpu.memory_space<vmem>>, %arg2: memref<128x32xf32, #tpu.memory_space<vmem>>, %arg3: memref<8x32xf32, #tpu.memory_space<vmem>>) attributes {dimension_semantics = [#tpu.dimension_semantics<core_parallel>], iteration_bounds = array<i64: 6>, scalar_prefetch = 0 : i64, scratch_operands = 0 : i64, tpu.core_type = #tpu.core_type<tc>, window_params = [{transform_indices = @transform_0, window_bounds = array<i64: 8, 8>}, {pipeline_mode = #tpu.pipeline_mode<synchronous>, transform_indices = @transform_1, window_bounds = array<i64: 128, 32>}, {transform_indices = @transform_2, window_bounds = array<i64: 8, 32>}]} {
    %c0 = arith.constant 0 : index
    %c0_0 = arith.constant 0 : index
    %0 = vector.load %arg2[%c0, %c0_0] : memref<128x32xf32, #tpu.memory_space<vmem>>, vector<128x32xf32>
    %c0_1 = arith.constant 0 : index
    %c0_2 = arith.constant 0 : index
    %1 = vector.load %arg1[%c0_1, %c0_2] : memref<8x8xf32, #tpu.memory_space<vmem>>, vector<8x8xf32>
    %cst = arith.constant 0.000000e+00 : f32
    %2 = vector.broadcast %cst : f32 to vector<8x120xf32>
    %3 = tpu.concatenate %1, %2 in 1 : vector<8x8xf32>, vector<8x120xf32> -> vector<8x128xf32>
    %4 = arith.truncf %3 : vector<8x128xf32> to vector<8x128xbf16>
    %5 = arith.extf %4 : vector<8x128xbf16> to vector<8x128xf32>
    %6 = arith.subf %3, %5 : vector<8x128xf32>
    %7 = arith.truncf %6 : vector<8x128xf32> to vector<8x128xbf16>
    %8 = arith.extf %7 : vector<8x128xbf16> to vector<8x128xf32>
    %9 = arith.subf %6, %8 : vector<8x128xf32>
    %cst_3 = arith.constant dense<0.000000e+00> : vector<8x32xf32>
    %10 = tpu.matmul %5, %0, %cst_3 {dimension_numbers = #tpu.dot_dimension_numbers<[1], [0], [0], [1], [0, 0, 1, 1], [], []>} : vector<8x128xf32>, vector<128x32xf32>, vector<8x32xf32> -> vector<8x32xf32>
    %cst_4 = arith.constant dense<0.000000e+00> : vector<8x32xf32>
    %11 = tpu.matmul %8, %0, %cst_4 {dimension_numbers = #tpu.dot_dimension_numbers<[1], [0], [0], [1], [0, 0, 1, 1], [], []>} : vector<8x128xf32>, vector<128x32xf32>, vector<8x32xf32> -> vector<8x32xf32>
    %12 = arith.addf %10, %11 : vector<8x32xf32>
    %cst_5 = arith.constant dense<0.000000e+00> : vector<8x32xf32>
    %13 = tpu.matmul %9, %0, %cst_5 {dimension_numbers = #tpu.dot_dimension_numbers<[1], [0], [0], [1], [0, 0, 1, 1], [], []>} : vector<8x128xf32>, vector<128x32xf32>, vector<8x32xf32> -> vector<8x32xf32>
    %14 = arith.addf %12, %13 : vector<8x32xf32>
    %c0_6 = arith.constant 0 : index
    %c0_7 = arith.constant 0 : index
    %15 = vector.load %arg3[%c0_6, %c0_7] : memref<8x32xf32, #tpu.memory_space<vmem>>, vector<8x32xf32>
    tpu.vector_store %arg3[%c0_6, %c0_7], %14 {strides = array<i32>} : memref<8x32xf32, #tpu.memory_space<vmem>>, vector<8x32xf32>,
    return
  }
  func.func @transform_0(%arg0: i32) -> (i32, i32) {
    %c0_i32 = arith.constant 0 : i32
    %c0_i32_0 = arith.constant 0 : i32
    return %arg0, %c0_i32 : i32, i32
  }
  func.func @transform_1(%arg0: i32) -> (i32, i32) {
    %c0_i32 = arith.constant 0 : i32
    %c0_i32_0 = arith.constant 0 : i32
    %c0_i32_1 = arith.constant 0 : i32
    return %c0_i32, %c0_i32_0 : i32, i32
  }
  func.func @transform_2(%arg0: i32) -> (i32, i32) {
    %c0_i32 = arith.constant 0 : i32
    %c0_i32_0 = arith.constant 0 : i32
    return %arg0, %c0_i32 : i32, i32
  }
}

module attributes {stable_mosaic.version = 11 : i64} {
  func.func @_upsample_kernel(%arg0: i32, %arg1: memref<8x8xf32, #tpu.memory_space<vmem>>, %arg2: memref<128x32xf32, #tpu.memory_space<vmem>>, %arg3: memref<8x32xf32, #tpu.memory_space<vmem>>) attributes {dimension_semantics = [#tpu.dimension_semantics<parallel>], iteration_bounds = array<i64: 6>, scalar_prefetch = 0 : i64, scratch_operands = 0 : i64, tpu.core_type = #tpu.core_type<tc>, window_params = [{transform_indices = @transform_0, window_bounds = array<i64: 8, 8>}, {pipeline_mode = #tpu.pipeline_mode<synchronous>, transform_indices = @transform_1, window_bounds = array<i64: 128, 32>}, {transform_indices = @transform_2, window_bounds = array<i64: 8, 32>}]} {
    %c0 = arith.constant 0 : index
    %c0_0 = arith.constant 0 : index
    %0 = vector.load %arg2[%c0, %c0_0] : memref<128x32xf32, #tpu.memory_space<vmem>>, vector<128x32xf32>
    %c0_1 = arith.constant 0 : index
    %c0_2 = arith.constant 0 : index
    %1 = vector.load %arg1[%c0_1, %c0_2] : memref<8x8xf32, #tpu.memory_space<vmem>>, vector<8x8xf32>
    %cst = arith.constant 0.000000e+00 : f32
    %2 = vector.broadcast %cst : f32 to vector<8x120xf32>
    %3 = tpu.concatenate %1, %2 in 1 : vector<8x8xf32>, vector<8x120xf32> -> vector<8x128xf32>
    %4 = arith.truncf %3 : vector<8x128xf32> to vector<8x128xbf16>
    %5 = arith.extf %4 : vector<8x128xbf16> to vector<8x128xf32>
    %6 = arith.subf %3, %5 : vector<8x128xf32>
    %7 = arith.truncf %6 : vector<8x128xf32> to vector<8x128xbf16>
    %8 = arith.extf %7 : vector<8x128xbf16> to vector<8x128xf32>
    %9 = arith.subf %6, %8 : vector<8x128xf32>
    %cst_3 = arith.constant dense<0.000000e+00> : vector<8x32xf32>
    %10 = tpu.matmul %5, %0, %cst_3 {dimension_numbers = #tpu.dot_dimension_numbers<[1], [0], [0], [1], [0, 0, 1, 1], [], []>} : vector<8x128xf32>, vector<128x32xf32>, vector<8x32xf32> -> vector<8x32xf32>
    %cst_4 = arith.constant dense<0.000000e+00> : vector<8x32xf32>
    %11 = tpu.matmul %8, %0, %cst_4 {dimension_numbers = #tpu.dot_dimension_numbers<[1], [0], [0], [1], [0, 0, 1, 1], [], []>} : vector<8x128xf32>, vector<128x32xf32>, vector<8x32xf32> -> vector<8x32xf32>
    %12 = arith.addf %10, %11 : vector<8x32xf32>
    %cst_5 = arith.constant dense<0.000000e+00> : vector<8x32xf32>
    %13 = tpu.matmul %9, %0, %cst_5 {dimension_numbers = #tpu.dot_dimension_numbers<[1], [0], [0], [1], [0, 0, 1, 1], [], []>} : vector<8x128xf32>, vector<128x32xf32>, vector<8x32xf32> -> vector<8x32xf32>
    %14 = arith.addf %12, %13 : vector<8x32xf32>
    %c0_6 = arith.constant 0 : index
    %c0_7 = arith.constant 0 : index
    %15 = vector.load %arg3[%c0_6, %c0_7] : memref<8x32xf32, #tpu.memory_space<vmem>>, vector<8x32xf32>
    tpu.vector_store %arg3[%c0_6, %c0_7], %14 {strides = array<i32>} : memref<8x32xf32, #tpu.memory_space<vmem>>, vector<8x32xf32>,
    return
  }
  func.func @transform_0(%arg0: i32) -> (i32, i32) {
    %c0_i32 = arith.constant 0 : i32
    %c0_i32_0 = arith.constant 0 : i32
    return %arg0, %c0_i32 : i32, i32
  }
  func.func @transform_1(%arg0: i32) -> (i32, i32) {
    %c0_i32 = arith.constant 0 : i32
    %c0_i32_0 = arith.constant 0 : i32
    %c0_i32_1 = arith.constant 0 : i32
    return %c0_i32, %c0_i32_0 : i32, i32
  }
  func.func @transform_2(%arg0: i32) -> (i32, i32) {
    %c0_i32 = arith.constant 0 : i32
    %c0_i32_0 = arith.constant 0 : i32
    return %arg0, %c0_i32 : i32, i32
  }
}

module attributes {stable_mosaic.version = 11 : i64} {
  func.func @_upsample_kernel(%arg0: i32, %arg1: memref<8x8xf32, #tpu.memory_space<vmem>>, %arg2: memref<128x32xf32, #tpu.memory_space<vmem>>, %arg3: memref<8x32xf32, #tpu.memory_space<vmem>>) attributes {dimension_semantics = [#tpu.dimension_semantics<arbitrary>], iteration_bounds = array<i64: 6>, scalar_prefetch = 0 : i64, scratch_operands = 0 : i64, tpu.core_type = #tpu.core_type<tc>, window_params = [{transform_indices = @transform_0, window_bounds = array<i64: 8, 8>}, {pipeline_mode = #tpu.pipeline_mode<synchronous>, transform_indices = @transform_1, window_bounds = array<i64: 128, 32>}, {transform_indices = @transform_2, window_bounds = array<i64: 8, 32>}]} {
    %c0 = arith.constant 0 : index
    %c0_0 = arith.constant 0 : index
    %0 = vector.load %arg2[%c0, %c0_0] : memref<128x32xf32, #tpu.memory_space<vmem>>, vector<128x32xf32>
    %c0_1 = arith.constant 0 : index
    %c0_2 = arith.constant 0 : index
    %1 = vector.load %arg1[%c0_1, %c0_2] : memref<8x8xf32, #tpu.memory_space<vmem>>, vector<8x8xf32>
    %cst = arith.constant 0.000000e+00 : f32
    %2 = vector.broadcast %cst : f32 to vector<8x120xf32>
    %3 = tpu.concatenate %1, %2 in 1 : vector<8x8xf32>, vector<8x120xf32> -> vector<8x128xf32>
    %4 = arith.truncf %3 : vector<8x128xf32> to vector<8x128xbf16>
    %5 = arith.extf %4 : vector<8x128xbf16> to vector<8x128xf32>
    %6 = arith.subf %3, %5 : vector<8x128xf32>
    %7 = arith.truncf %6 : vector<8x128xf32> to vector<8x128xbf16>
    %8 = arith.extf %7 : vector<8x128xbf16> to vector<8x128xf32>
    %9 = arith.subf %6, %8 : vector<8x128xf32>
    %cst_3 = arith.constant dense<0.000000e+00> : vector<8x32xf32>
    %10 = tpu.matmul %5, %0, %cst_3 {dimension_numbers = #tpu.dot_dimension_numbers<[1], [0], [0], [1], [0, 0, 1, 1], [], []>} : vector<8x128xf32>, vector<128x32xf32>, vector<8x32xf32> -> vector<8x32xf32>
    %cst_4 = arith.constant dense<0.000000e+00> : vector<8x32xf32>
    %11 = tpu.matmul %8, %0, %cst_4 {dimension_numbers = #tpu.dot_dimension_numbers<[1], [0], [0], [1], [0, 0, 1, 1], [], []>} : vector<8x128xf32>, vector<128x32xf32>, vector<8x32xf32> -> vector<8x32xf32>
    %12 = arith.addf %10, %11 : vector<8x32xf32>
    %cst_5 = arith.constant dense<0.000000e+00> : vector<8x32xf32>
    %13 = tpu.matmul %9, %0, %cst_5 {dimension_numbers = #tpu.dot_dimension_numbers<[1], [0], [0], [1], [0, 0, 1, 1], [], []>} : vector<8x128xf32>, vector<128x32xf32>, vector<8x32xf32> -> vector<8x32xf32>
    %14 = arith.addf %12, %13 : vector<8x32xf32>
    %c0_6 = arith.constant 0 : index
    %c0_7 = arith.constant 0 : index
    %15 = vector.load %arg3[%c0_6, %c0_7] : memref<8x32xf32, #tpu.memory_space<vmem>>, vector<8x32xf32>
    tpu.vector_store %arg3[%c0_6, %c0_7], %14 {strides = array<i32>} : memref<8x32xf32, #tpu.memory_space<vmem>>, vector<8x32xf32>,
    return
  }
  func.func @transform_0(%arg0: i32) -> (i32, i32) {
    %c0_i32 = arith.constant 0 : i32
    %c0_i32_0 = arith.constant 0 : i32
    return %arg0, %c0_i32 : i32, i32
  }
  func.func @transform_1(%arg0: i32) -> (i32, i32) {
    %c0_i32 = arith.constant 0 : i32
    %c0_i32_0 = arith.constant 0 : i32
    %c0_i32_1 = arith.constant 0 : i32
    return %c0_i32, %c0_i32_0 : i32, i32
  }
  func.func @transform_2(%arg0: i32) -> (i32, i32) {
    %c0_i32 = arith.constant 0 : i32
    %c0_i32_0 = arith.constant 0 : i32
    return %arg0, %c0_i32 : i32, i32
  }
}

module attributes {stable_mosaic.version = 11 : i64} {
  func.func @_upsample_kernel(%arg0: i32, %arg1: memref<16x16xf32, #tpu.memory_space<vmem>>, %arg2: memref<128x64xf32, #tpu.memory_space<vmem>>, %arg3: memref<16x64xf32, #tpu.memory_space<vmem>>) attributes {dimension_semantics = [#tpu.dimension_semantics<arbitrary>], iteration_bounds = array<i64: 8>, scalar_prefetch = 0 : i64, scratch_operands = 0 : i64, tpu.core_type = #tpu.core_type<tc>, window_params = [{transform_indices = @transform_0, window_bounds = array<i64: 16, 16>}, {pipeline_mode = #tpu.pipeline_mode<synchronous>, transform_indices = @transform_1, window_bounds = array<i64: 128, 64>}, {transform_indices = @transform_2, window_bounds = array<i64: 16, 64>}]} {
    %c0 = arith.constant 0 : index
    %c0_0 = arith.constant 0 : index
    %0 = vector.load %arg2[%c0, %c0_0] : memref<128x64xf32, #tpu.memory_space<vmem>>, vector<128x64xf32>
    %c0_1 = arith.constant 0 : index
    %c0_2 = arith.constant 0 : index
    %1 = vector.load %arg1[%c0_1, %c0_2] : memref<16x16xf32, #tpu.memory_space<vmem>>, vector<16x16xf32>
    %cst = arith.constant 0.000000e+00 : f32
    %2 = vector.broadcast %cst : f32 to vector<16x112xf32>
    %3 = tpu.concatenate %1, %2 in 1 : vector<16x16xf32>, vector<16x112xf32> -> vector<16x128xf32>
    %4 = arith.truncf %3 : vector<16x128xf32> to vector<16x128xbf16>
    %5 = arith.extf %4 : vector<16x128xbf16> to vector<16x128xf32>
    %6 = arith.subf %3, %5 : vector<16x128xf32>
    %7 = arith.truncf %6 : vector<16x128xf32> to vector<16x128xbf16>
    %8 = arith.extf %7 : vector<16x128xbf16> to vector<16x128xf32>
    %9 = arith.subf %6, %8 : vector<16x128xf32>
    %cst_3 = arith.constant dense<0.000000e+00> : vector<16x64xf32>
    %10 = tpu.matmul %5, %0, %cst_3 {dimension_numbers = #tpu.dot_dimension_numbers<[1], [0], [0], [1], [0, 0, 1, 1], [], []>} : vector<16x128xf32>, vector<128x64xf32>, vector<16x64xf32> -> vector<16x64xf32>
    %cst_4 = arith.constant dense<0.000000e+00> : vector<16x64xf32>
    %11 = tpu.matmul %8, %0, %cst_4 {dimension_numbers = #tpu.dot_dimension_numbers<[1], [0], [0], [1], [0, 0, 1, 1], [], []>} : vector<16x128xf32>, vector<128x64xf32>, vector<16x64xf32> -> vector<16x64xf32>
    %12 = arith.addf %10, %11 : vector<16x64xf32>
    %cst_5 = arith.constant dense<0.000000e+00> : vector<16x64xf32>
    %13 = tpu.matmul %9, %0, %cst_5 {dimension_numbers = #tpu.dot_dimension_numbers<[1], [0], [0], [1], [0, 0, 1, 1], [], []>} : vector<16x128xf32>, vector<128x64xf32>, vector<16x64xf32> -> vector<16x64xf32>
    %14 = arith.addf %12, %13 : vector<16x64xf32>
    %c0_6 = arith.constant 0 : index
    %c0_7 = arith.constant 0 : index
    %15 = vector.load %arg3[%c0_6, %c0_7] : memref<16x64xf32, #tpu.memory_space<vmem>>, vector<16x64xf32>
    tpu.vector_store %arg3[%c0_6, %c0_7], %14 {strides = array<i32>} : memref<16x64xf32, #tpu.memory_space<vmem>>, vector<16x64xf32>,
    return
  }
  func.func @transform_0(%arg0: i32) -> (i32, i32) {
    %c0_i32 = arith.constant 0 : i32
    %c0_i32_0 = arith.constant 0 : i32
    return %arg0, %c0_i32 : i32, i32
  }
  func.func @transform_1(%arg0: i32) -> (i32, i32) {
    %c0_i32 = arith.constant 0 : i32
    %c0_i32_0 = arith.constant 0 : i32
    %c0_i32_1 = arith.constant 0 : i32
    return %c0_i32, %c0_i32_0 : i32, i32
  }
  func.func @transform_2(%arg0: i32) -> (i32, i32) {
    %c0_i32 = arith.constant 0 : i32
    %c0_i32_0 = arith.constant 0 : i32
    return %arg0, %c0_i32 : i32, i32
  }
}

</mosaic_0001>

<bundles_post_ra>
// kernel: _upsample_pallas.1
= control target key start
LH: loop header
LB: loop body
LE: loop exit
PB: predicated region body
PF: predicated region fallthrough
CT: control target
= control target key end

     0   :  { %7 = vsyncpa [#allocation3], 0  ;;  %s1079_s0 = inlined_call_operand.hbm [shape: f32[48,8], index: 0, kind: input, shape index: {}]   ;;  %s1080_s1 = inlined_call_operand.hbm [shape: f32[128,32], index: 1, kind: input, shape index: {}]   ;;  %s1081_s2 = inlined_call_operand.vmem [shape: f32[48,32], index: 2, kind: output, shape index: {}]  }
   0x1   :  { %9 = vsyncpa [#allocation3 + $0x1], 0 }
   0x2   :  { %10 = vsyncpa [#allocation5], 0  ;;  %s905_s9 = smov 0   ;;  %s907_s10 = smov 0  }
   0x3   :  { %s909_s11 = smov 0   ;;  %s911_s12 = smov 0  }
   0x4 LB: > { %s924_s13 = sadd.s32 4294967295, %s881_s12   ;;  %p36_p0 = scmp.ne.s32.totalorder %s873_s10, %s869_s9  ;;  %s881_s12 = sphi %s911_s12, %s1096_s12   ;;  %s877_s11 = sphi %s909_s11, %s1095_s11   ;;  %s873_s10 = sphi %s907_s10, %s1094_s10   ;;  %s869_s9 = sphi %s905_s9, %s1093_s9  }
   0x5   : > { %p1082_p1 = scmp.eq.s32.totalorder %s924_s13, 0  ;;  %p488_p2 = scmp.ge.s32.totalorder %s881_s12, 1 }
   0x6   : > { %p94_p3 = scmp.lt.s32.totalorder %s881_s12, 7  ;;  %s883_s16 = smov [#allocation4]  }
   0x7   : > { %p932_p4 = por %p1082_p1, %p36_p0  ;;  %s106_s17 = sshll.u32 %s883_s16, 4  ;;  %s107_s17 = int_to_ptr.vmem [resolvable:$true] %s106_s17 }
   0x8   : > { %p936_p5 = pnand %p488_p2, %p94_p3  ;;  %s949_s19 = sadd.s32 1, %s881_s12  }
   0x9   : > { %s1085_s14 = scalar_select %p932_p4, 1, 0 }
   0xa   : > { %s1086_s15 = scalar_select %p936_p5, 1, 0 }
   0xb   : > { %p736_p6 = pneg %p936_p5  ;;  %s23_s20 = sadd.s32 1, %s877_s11 }
   0xc   : > { %s20_s21 = ssub.s32 %s881_s12, %s949_s19  ;;  %s785_s24 = scalar_lea.hbm %s1080_s1, 2048 }
   0xd   : > { %p944_p7 = pnand %p736_p6, %p1082_p1  ;;  %p786_p8 = scmp.ne.s32.totalorder %s1080_s1, %s785_s24 }
   0xe   : > { %p792_p12 = scmp.lt.u32.totalorder %s785_s24, %s1080_s1 }
   0xf   : > { %p787_p9 = pneg %p944_p7 }
  0x11   : > { %p788_p10 = pnand %p787_p9, %p786_p8 }
  0x13   : > { %p789_p11 = pneg %p788_p10 }
  0x15   : > { %p794_p13 = pnand %p792_p12, %p789_p11 }
  0x17   : > { %797 = shalt.err (!%p794_p13)
}
  0x18   : > { %s798_s29 = scalar_lea.vmem %s107_s17, 2048  ;;  %p806_p6 = scmp.lt.s32.totalorder %s107_s17, %s107_s17 }
  0x19   : > { %p799_p0 = scmp.ne.s32.totalorder %s107_s17, %s798_s29  ;;  %p807_p1 = scmp.lt.s32.totalorder %s798_s29, %s798_s29 }
  0x1b   : > { %p801_p2 = pnand %p799_p0, %p787_p9  ;;  %p808_p4 = por %p807_p1, %p806_p6 }
  0x1d   : > { %p802_p3 = pneg %p801_p2 }
  0x1f   : > { %p809_p5 = pnand %p808_p4, %p802_p3 }
  0x21   : > { %812 = shalt.err (!%p809_p5)
}
  0x22   : > { %s884_s30 = smov 128   ;;  %s885_s3 = smov 8  }
  0x23   : > { %739 = dma.hbm_to_vmem [thread:$0]  (!%p944_p7), %s1080_s1, 2048, %s107_s17, [#allocation5], %s884_s30, %s884_s30, %s885_s3  }
  0x24   : > { %p21_p8 = scmp.eq.s32.totalorder %s20_s21, 0  ;;  %p30_p9 = scmp.ne.s32.totalorder %s877_s11, %s873_s10 }
  0x25   : > { %p31_p1 = scmp.eq.s32.totalorder %s881_s12, 0  ;;  %p745_p4 = scmp.lt.s32.totalorder %s881_s12, 6 }
  0x26   : > { %s975_s6 = scalar_select %p21_p8, %s877_s11, %s23_s20  }
  0x27   : > { %p32_p5 = por %p31_p1, %p30_p9  ;;  %s120_s7 = sand.u32 1, %s877_s11  }
  0x28   : > { %s491_s8 = sshll.u32 %s120_s7, 3  ;;  %s492_s9 = sshll.u32 %s881_s12, 7 }
  0x29   : > { %s982_s23 = scalar_lea.hbm %s1079_s0, %s492_s9  ;;  %s124_s17 = scalar_lea.vmem [#allocation2], %s491_s8 }
  0x2a   : > { %s131_s18 = sshll.u32 %s124_s17, 4  ;;  %p986_p7 = pnand %p745_p4, %p32_p5  ;;  %s984_s18 = int_to_ptr.vmem [resolvable:$true] %s131_s18 }
  0x2b   : > { %s121_s12 = scalar_lea.sflag [#allocation3], %s120_s7  ;;  %s813_s21 = scalar_lea.hbm %s982_s23, 128 }
  0x2c   : > { %p814_p10 = scmp.ne.s32.totalorder %s982_s23, %s813_s21  ;;  %p815_p11 = pneg %p986_p7 }
  0x2d   : > { %s818_s26 = scalar_lea.hbm %s1079_s0, 768  ;;  %p819_p0 = scmp.lt.u32.totalorder %s982_s23, %s1079_s0 }
  0x2e   : > { %p816_p12 = pnand %p815_p11, %p814_p10  ;;  %p820_p2 = scmp.lt.u32.totalorder %s818_s26, %s813_s21 }
  0x2f   : > { %p822_p6 = scmp.lt.u32.totalorder %s813_s21, %s982_s23 }
  0x30   : > { %p817_p13 = pneg %p816_p12  ;;  %p821_p3 = por %p820_p2, %p819_p0 }
  0x32   : > { %p823_p8 = por %p822_p6, %p821_p3 }
  0x34   : > { %p824_p9 = pnand %p823_p8, %p817_p13 }
  0x36   : > { %827 = shalt.err (!%p824_p9)
}
  0x37   : > { %s828_s29 = scalar_lea.vmem %s984_s18, 128  ;;  %s886_s30 = smov [#allocation2]  }
  0x38   : > { %p829_p1 = scmp.ne.s32.totalorder %s984_s18, %s828_s29  ;;  %s833_s3 = sshll.u32 %s886_s30, 4  ;;  %s834_s3 = int_to_ptr.vmem [resolvable:$false] %s833_s3 }
  0x39   : > { %s835_s4 = scalar_lea.vmem %s834_s3, 256  ;;  %p836_p10 = scmp.lt.s32.totalorder %s984_s18, %s834_s3 }
  0x3a   : > { %p831_p4 = pnand %p829_p1, %p815_p11  ;;  %p837_p12 = scmp.lt.s32.totalorder %s835_s4, %s828_s29 }
  0x3c   : > { %p832_p5 = pneg %p831_p4  ;;  %p838_p0 = por %p837_p12, %p836_p10 }
  0x3e   : > { %p839_p2 = pnand %p838_p0, %p832_p5 }
  0x40   : > { %842 = shalt.err (!%p839_p2)
}
  0x41   : > { %743 = dma.hbm_to_vmem [thread:$0]  (!%p986_p7), %s982_s23, 128, %s984_s18, %s121_s12  }
  0x42   : > { %p1089_p13 = scmp.ne.s32.totalorder %s1086_s15, 0 }
  0x43   : > { %s142_s5 = sand.u32 (!%p1089_p13), 1, %s873_s10   ;;  %p1090_p11 = scmp.ne.s32.totalorder (!%p1089_p13), %s1085_s14, 0 }
  0x44   : > { %140 = sbr.rel (%p1089_p13) target bundleno = 360 (0x168), region = 28  ;;  %s1018_s7 = sshll.u32 (!%p1089_p13), %s142_s5, 3 }
  0x45   : > { %s143_s8 = scalar_lea.sflag (!%p1089_p13), [#allocation3], %s142_s5  ;;  %s146_s9 = scalar_lea.vmem (!%p1089_p13), [#allocation2], %s1018_s7 }
  0x4b   : > { %860 = dma.done.wait (%p1090_p11), %s143_s8, 128  }
  0x4c   : > { %862 = vsyncadd (%p1090_p11), %s143_s8, 4294967168  ;;  %p1091_p3 = scmp.eq.s32.totalorder %s924_s13, 0 }
  0x4e   : > { %864 = dma.done.wait (%p1091_p3), [#allocation5], 2048   ;;  %p1092_p7 = pmov %p1091_p3 }
  0x4f   : > { %v887_v0 = vmov 0.0|0.0   ;;  %vm888_vm0 = vmmov 0   ;;  %v889_v1 = vmov 0.0   ;;  %v174_v2 = vld [vmem:[#allocation4] sm:$0xff]  ;;  %v175_v3 = vld [vmem:[#allocation4 + $0x8] sm:$0xff]  ;;  %v176_v4 = vld [vmem:[#allocation4 + $0x10] sm:$0xff] }
  0x50   : > { %866 = vsyncadd (%p1092_p7), [#allocation5], 4294965248  ;;  %679 = vmatprep.subr.bf16.mxu0 %v887_v0  ;;  %655 = vmatprep.subr.bf16.mxu1 %v887_v0  ;;  %v656_v5 = vpack.c.bf16 %v175_v3, %v174_v2  ;;  %v177_v6 = vld [vmem:[#allocation4 + $0x18] sm:$0xff]  ;;  %v178_v8 = vld [vmem:[#allocation4 + $0x20] sm:$0xff]  ;;  %vm191_vm1 = vcmask 64512   ;;  %p170_p6 = scmp.lt.s32.totalorder %s924_s13, 5 }
  0x51   : > { %617 = vmatprep.mubr.msk.f32.mxu0 %vm888_vm0, %v889_v1  ;;  %582 = vmatprep.mubr.msk.f32.mxu1 %vm888_vm0, %v889_v1  ;;  %v659_v7 = vpack.c.bf16 %v177_v6, %v176_v4  ;;  %v179_v9 = vld [vmem:[#allocation4 + $0x28] sm:$0xff]  ;;  %v180_v11 = vld [vmem:[#allocation4 + $0x30] sm:$0xff]  ;;  %v181_v12 = vld [vmem:[#allocation4 + $0x38] sm:$0xff]  ;;  %vm410_vm2 = vcmask 261120  }
  0x52   : > { %681 = vmatpush3.bf16.msra.mxu0 %v656_v5  ;;  %657 = vmatpush3.bf16.msra.mxu1 %v656_v5  ;;  %v662_v10 = vpack.c.bf16 %v179_v9, %v178_v8  ;;  %v190_v13 = vld [vmem:[%s146_s9] sm:$0xff]  ;;  %v665_v14 = vpack.c.bf16 %v181_v12, %v180_v11  ;;  %v182_v15 = vld [vmem:[#allocation4 + $0x40] sm:$0xff]  ;;  %v183_v16 = vld [vmem:[#allocation4 + $0x48] sm:$0xff]  ;;  %s1098_s13 = smov (!%p170_p6, %s924_s13), 5 }
  0x53   : > { %682 = vmatprep.subr.bf16.mxu0 %v887_v0  ;;  %658 = vmatprep.subr.bf16.mxu1 %v887_v0  ;;  %v192_v17 = vsel %vm191_vm1, %v190_v13, 0.0  ;;  %v668_v18 = vpack.c.bf16 %v183_v16, %v182_v15  ;;  %v184_v19 = vld [vmem:[#allocation4 + $0x50] sm:$0xff]  ;;  %v185_v20 = vld [vmem:[#allocation4 + $0x58] sm:$0xff]  ;;  %v186_v23 = vld [vmem:[#allocation4 + $0x60] sm:$0xff]  ;;  %s496_s14 = sshll.u32 %s1098_s13, 3 }
  0x54   : > { %v193_v21 = vpack.c.bf16 %v192_v17, %v192_v17  ;;  %v671_v22 = vpack.c.bf16 %v185_v20, %v184_v19  ;;  %v187_v24 = vld [vmem:[#allocation4 + $0x68] sm:$0xff]  ;;  %v188_v28 = vld [vmem:[#allocation4 + $0x70] sm:$0xff]  ;;  %v189_v29 = vld [vmem:[#allocation4 + $0x78] sm:$0xff]  ;;  %s173_s22 = scalar_lea.vmem %s1081_s2, %s496_s14 }
  0x55   : > { %v674_v27 = vpack.c.bf16 %v187_v24, %v186_v23  ;;  %v677_v31 = vpack.c.bf16 %v189_v29, %v188_v28 }
  0x56   : > { %684 = vmatpush3.bf16.msra.mxu0 %v659_v7  ;;  %660 = vmatpush3.bf16.msra.mxu1 %v659_v7  ;;  %v194_v25 = vunpack.c.l.bf16 %v193_v21 }
  0x57   : > { %685 = vmatprep.subr.bf16.mxu0 %v887_v0  ;;  %661 = vmatprep.subr.bf16.mxu1 %v887_v0 }
  0x58   : > { %v195_v26 = vsub.f32 %v192_v17, %v194_v25 }
  0x5a   : > { %687 = vmatpush3.bf16.msra.mxu0 %v662_v10  ;;  %663 = vmatpush3.bf16.msra.mxu1 %v662_v10  ;;  %v196_v30 = vpack.c.bf16 %v195_v26, %v195_v26 }
  0x5b   : > { %688 = vmatprep.subr.bf16.mxu0 %v887_v0  ;;  %664 = vmatprep.subr.bf16.mxu1 %v887_v0 }
  0x5c   : > { %v197_v32 = vunpack.c.l.bf16 %v196_v30 }
  0x5e   : > { %690 = vmatpush3.bf16.msra.mxu0 %v665_v14  ;;  %666 = vmatpush3.bf16.msra.mxu1 %v665_v14  ;;  %v198_v33 = vsub.f32 %v195_v26, %v197_v32 }
  0x5f   : > { %691 = vmatprep.subr.bf16.mxu0 %v887_v0  ;;  %667 = vmatprep.subr.bf16.mxu1 %v887_v0 }
  0x62   : > { %693 = vmatpush3.bf16.msra.mxu0 %v668_v18  ;;  %669 = vmatpush3.bf16.msra.mxu1 %v668_v18 }
  0x63   : > { %694 = vmatprep.subr.bf16.mxu0 %v887_v0  ;;  %670 = vmatprep.subr.bf16.mxu1 %v887_v0 }
  0x66   : > { %696 = vmatpush3.bf16.msra.mxu0 %v671_v22  ;;  %672 = vmatpush3.bf16.msra.mxu1 %v671_v22 }
  0x67   : > { %697 = vmatprep.subr.bf16.mxu0 %v887_v0  ;;  %673 = vmatprep.subr.bf16.mxu1 %v887_v0 }
  0x6a   : > { %699 = vmatpush3.bf16.msra.mxu0 %v674_v27  ;;  %675 = vmatpush3.bf16.msra.mxu1 %v674_v27 }
  0x6b   : > { %700 = vmatprep.subr.bf16.mxu0 %v887_v0  ;;  %676 = vmatprep.subr.bf16.mxu1 %v887_v0 }
  0x6e   : > { %702 = vmatpush3.bf16.msra.mxu0 %v677_v31  ;;  %678 = vmatpush3.bf16.msra.mxu1 %v677_v31 }
  0x6f   : > { %703 = vmatprep.subr.bf16.mxu0 %v887_v0 }
  0x71   : > { %618 = vmatmul.mubr.f32.vlgmr.msra.gmra.mrb[0].mxu0 %v194_v25  ;;  %583 = vmatmul.mubr.f32.vlgmr.msra.gmra.mrb[0].mxu1 %v197_v32 }
  0x72   : > { %705 = vmatpush3.bf16.msra.mxu0 %v656_v5  ;;  %652 = vmatprep.mubr.msk.f32.mxu0 %vm888_vm0, %v889_v1 }
  0x73   : > { %706 = vmatprep.subr.bf16.mxu0 %v887_v0 }
  0x76   : > { %708 = vmatpush3.bf16.msra.mxu0 %v659_v7 }
  0x77   : > { %709 = vmatprep.subr.bf16.mxu0 %v887_v0 }
  0x7a   : > { %711 = vmatpush3.bf16.msra.mxu0 %v662_v10 }
  0x7b   : > { %712 = vmatprep.subr.bf16.mxu0 %v887_v0 }
  0x7e   : > { %714 = vmatpush3.bf16.msra.mxu0 %v665_v14 }
  0x7f   : > { %715 = vmatprep.subr.bf16.mxu0 %v887_v0 }
  0x82   : > { %717 = vmatpush3.bf16.msra.mxu0 %v668_v18 }
  0x83   : > { %718 = vmatprep.subr.bf16.mxu0 %v887_v0 }
  0x86   : > { %720 = vmatpush3.bf16.msra.mxu0 %v671_v22 }
  0x87   : > { %721 = vmatprep.subr.bf16.mxu0 %v887_v0 }
  0x8a   : > { %723 = vmatpush3.bf16.msra.mxu0 %v674_v27 }
  0x8b   : > { %724 = vmatprep.subr.bf16.mxu0 %v887_v0 }
  0x8e   : > { %726 = vmatpush3.bf16.msra.mxu0 %v677_v31 }
  0x91   : > { %653 = vmatmul.mubr.f32.vlgmr.msra.gmra.mrb[0].mxu0 %v198_v33 }
 0x144   : > { %v265_v34 = vpop.f32.mrb[0].mxu1 }
 0x145   : > { %v584_v35 = vpop.f32.mrb[1].mxu1 }
 0x164   : > { %v405_v36 = vpop.f32.mrb[0].mxu0 }
 0x165   : > { %v727_v37 = vadd.f32 %v405_v36, %v265_v34  ;;  %v654_v38 = vpop.f32.mrb[1].mxu0 }
 0x167   : > { %411 = vst.msk [vmem:[%s173_s22] sm:$0xff] %vm410_vm2, %v727_v37 }
 0x168 PF: > { %p13_p8 = scmp.ge.s32.totalorder %s949_s19, 8   ;;  %s1093_s9 = smov %s873_s10 }
 0x169   : > { %s1094_s10 = smov %s877_s11  ;;  %s1095_s11 = smov %s975_s6 }
 0x16a   : > { %s1096_s12 = smov %s949_s19  ;;  %15 = sbr.rel (!%p13_p8) target bundleno = 4 (0x4), region = 72 }
 0x171   :  { %431 = vsyncpa [#allocation3], 1 }
 0x172   :  { %433 = vsyncpa [#allocation3 + $0x1], 1 }
 0x173   :  { %434 = vsyncpa [#allocation5], 1 }

// kernel: _upsample_pallas.1
= control target key start
LH: loop header
LB: loop body
LE: loop exit
PB: predicated region body
PF: predicated region fallthrough
CT: control target
= control target key end

     0   :  { %7 = vsyncpa [#allocation3], 0  ;;  %s1079_s0 = inlined_call_operand.hbm [shape: f32[48,8], index: 0, kind: input, shape index: {}]   ;;  %s1080_s1 = inlined_call_operand.hbm [shape: f32[128,32], index: 1, kind: input, shape index: {}]   ;;  %s1081_s2 = inlined_call_operand.vmem [shape: f32[48,32], index: 2, kind: output, shape index: {}]  }
   0x1   :  { %9 = vsyncpa [#allocation3 + $0x1], 0 }
   0x2   :  { %10 = vsyncpa [#allocation5], 0  ;;  %s905_s9 = smov 0   ;;  %s907_s10 = smov 0  }
   0x3   :  { %s909_s11 = smov 0   ;;  %s911_s12 = smov 0  }
   0x4 LB: > { %s924_s13 = sadd.s32 4294967295, %s881_s12   ;;  %p36_p0 = scmp.ne.s32.totalorder %s873_s10, %s869_s9  ;;  %s881_s12 = sphi %s911_s12, %s1096_s12   ;;  %s877_s11 = sphi %s909_s11, %s1095_s11   ;;  %s873_s10 = sphi %s907_s10, %s1094_s10   ;;  %s869_s9 = sphi %s905_s9, %s1093_s9  }
   0x5   : > { %p1082_p1 = scmp.eq.s32.totalorder %s924_s13, 0  ;;  %p488_p2 = scmp.ge.s32.totalorder %s881_s12, 1 }
   0x6   : > { %p94_p3 = scmp.lt.s32.totalorder %s881_s12, 7  ;;  %s883_s16 = smov [#allocation4]  }
   0x7   : > { %p932_p4 = por %p1082_p1, %p36_p0  ;;  %s106_s17 = sshll.u32 %s883_s16, 4  ;;  %s107_s17 = int_to_ptr.vmem [resolvable:$true] %s106_s17 }
   0x8   : > { %p936_p5 = pnand %p488_p2, %p94_p3  ;;  %s949_s19 = sadd.s32 1, %s881_s12  }
   0x9   : > { %s1085_s14 = scalar_select %p932_p4, 1, 0 }
   0xa   : > { %s1086_s15 = scalar_select %p936_p5, 1, 0 }
   0xb   : > { %p736_p6 = pneg %p936_p5  ;;  %s23_s20 = sadd.s32 1, %s877_s11 }
   0xc   : > { %s20_s21 = ssub.s32 %s881_s12, %s949_s19  ;;  %s785_s24 = scalar_lea.hbm %s1080_s1, 2048 }
   0xd   : > { %p944_p7 = pnand %p736_p6, %p1082_p1  ;;  %p786_p8 = scmp.ne.s32.totalorder %s1080_s1, %s785_s24 }
   0xe   : > { %p792_p12 = scmp.lt.u32.totalorder %s785_s24, %s1080_s1 }
   0xf   : > { %p787_p9 = pneg %p944_p7 }
  0x11   : > { %p788_p10 = pnand %p787_p9, %p786_p8 }
  0x13   : > { %p789_p11 = pneg %p788_p10 }
  0x15   : > { %p794_p13 = pnand %p792_p12, %p789_p11 }
  0x17   : > { %797 = shalt.err (!%p794_p13)
}
  0x18   : > { %s798_s29 = scalar_lea.vmem %s107_s17, 2048  ;;  %p806_p6 = scmp.lt.s32.totalorder %s107_s17, %s107_s17 }
  0x19   : > { %p799_p0 = scmp.ne.s32.totalorder %s107_s17, %s798_s29  ;;  %p807_p1 = scmp.lt.s32.totalorder %s798_s29, %s798_s29 }
  0x1b   : > { %p801_p2 = pnand %p799_p0, %p787_p9  ;;  %p808_p4 = por %p807_p1, %p806_p6 }
  0x1d   : > { %p802_p3 = pneg %p801_p2 }
  0x1f   : > { %p809_p5 = pnand %p808_p4, %p802_p3 }
  0x21   : > { %812 = shalt.err (!%p809_p5)
}
  0x22   : > { %s884_s30 = smov 128   ;;  %s885_s3 = smov 8  }
  0x23   : > { %739 = dma.hbm_to_vmem [thread:$0]  (!%p944_p7), %s1080_s1, 2048, %s107_s17, [#allocation5], %s884_s30, %s884_s30, %s885_s3  }
  0x24   : > { %p21_p8 = scmp.eq.s32.totalorder %s20_s21, 0  ;;  %p30_p9 = scmp.ne.s32.totalorder %s877_s11, %s873_s10 }
  0x25   : > { %p31_p1 = scmp.eq.s32.totalorder %s881_s12, 0  ;;  %p745_p4 = scmp.lt.s32.totalorder %s881_s12, 6 }
  0x26   : > { %s975_s6 = scalar_select %p21_p8, %s877_s11, %s23_s20  }
  0x27   : > { %p32_p5 = por %p31_p1, %p30_p9  ;;  %s120_s7 = sand.u32 1, %s877_s11  }
  0x28   : > { %s491_s8 = sshll.u32 %s120_s7, 3  ;;  %s492_s9 = sshll.u32 %s881_s12, 7 }
  0x29   : > { %s982_s23 = scalar_lea.hbm %s1079_s0, %s492_s9  ;;  %s124_s17 = scalar_lea.vmem [#allocation2], %s491_s8 }
  0x2a   : > { %s131_s18 = sshll.u32 %s124_s17, 4  ;;  %p986_p7 = pnand %p745_p4, %p32_p5  ;;  %s984_s18 = int_to_ptr.vmem [resolvable:$true] %s131_s18 }
  0x2b   : > { %s121_s12 = scalar_lea.sflag [#allocation3], %s120_s7  ;;  %s813_s21 = scalar_lea.hbm %s982_s23, 128 }
  0x2c   : > { %p814_p10 = scmp.ne.s32.totalorder %s982_s23, %s813_s21  ;;  %p815_p11 = pneg %p986_p7 }
  0x2d   : > { %s818_s26 = scalar_lea.hbm %s1079_s0, 768  ;;  %p819_p0 = scmp.lt.u32.totalorder %s982_s23, %s1079_s0 }
  0x2e   : > { %p816_p12 = pnand %p815_p11, %p814_p10  ;;  %p820_p2 = scmp.lt.u32.totalorder %s818_s26, %s813_s21 }
  0x2f   : > { %p822_p6 = scmp.lt.u32.totalorder %s813_s21, %s982_s23 }
  0x30   : > { %p817_p13 = pneg %p816_p12  ;;  %p821_p3 = por %p820_p2, %p819_p0 }
  0x32   : > { %p823_p8 = por %p822_p6, %p821_p3 }
  0x34   : > { %p824_p9 = pnand %p823_p8, %p817_p13 }
  0x36   : > { %827 = shalt.err (!%p824_p9)
}
  0x37   : > { %s828_s29 = scalar_lea.vmem %s984_s18, 128  ;;  %s886_s30 = smov [#allocation2]  }
  0x38   : > { %p829_p1 = scmp.ne.s32.totalorder %s984_s18, %s828_s29  ;;  %s833_s3 = sshll.u32 %s886_s30, 4  ;;  %s834_s3 = int_to_ptr.vmem [resolvable:$false] %s833_s3 }
  0x39   : > { %s835_s4 = scalar_lea.vmem %s834_s3, 256  ;;  %p836_p10 = scmp.lt.s32.totalorder %s984_s18, %s834_s3 }
  0x3a   : > { %p831_p4 = pnand %p829_p1, %p815_p11  ;;  %p837_p12 = scmp.lt.s32.totalorder %s835_s4, %s828_s29 }
  0x3c   : > { %p832_p5 = pneg %p831_p4  ;;  %p838_p0 = por %p837_p12, %p836_p10 }
  0x3e   : > { %p839_p2 = pnand %p838_p0, %p832_p5 }
  0x40   : > { %842 = shalt.err (!%p839_p2)
}
  0x41   : > { %743 = dma.hbm_to_vmem [thread:$0]  (!%p986_p7), %s982_s23, 128, %s984_s18, %s121_s12  }
  0x42   : > { %p1089_p13 = scmp.ne.s32.totalorder %s1086_s15, 0 }
  0x43   : > { %s142_s5 = sand.u32 (!%p1089_p13), 1, %s873_s10   ;;  %p1090_p11 = scmp.ne.s32.totalorder (!%p1089_p13), %s1085_s14, 0 }
  0x44   : > { %140 = sbr.rel (%p1089_p13) target bundleno = 360 (0x168), region = 28  ;;  %s1018_s7 = sshll.u32 (!%p1089_p13), %s142_s5, 3 }
  0x45   : > { %s143_s8 = scalar_lea.sflag (!%p1089_p13), [#allocation3], %s142_s5  ;;  %s146_s9 = scalar_lea.vmem (!%p1089_p13), [#allocation2], %s1018_s7 }
  0x4b   : > { %860 = dma.done.wait (%p1090_p11), %s143_s8, 128  }
  0x4c   : > { %862 = vsyncadd (%p1090_p11), %s143_s8, 4294967168  ;;  %p1091_p3 = scmp.eq.s32.totalorder %s924_s13, 0 }
  0x4e   : > { %864 = dma.done.wait (%p1091_p3), [#allocation5], 2048   ;;  %p1092_p7 = pmov %p1091_p3 }
  0x4f   : > { %v887_v0 = vmov 0.0|0.0   ;;  %vm888_vm0 = vmmov 0   ;;  %v889_v1 = vmov 0.0   ;;  %v174_v2 = vld [vmem:[#allocation4] sm:$0xff]  ;;  %v175_v3 = vld [vmem:[#allocation4 + $0x8] sm:$0xff]  ;;  %v176_v4 = vld [vmem:[#allocation4 + $0x10] sm:$0xff] }
  0x50   : > { %866 = vsyncadd (%p1092_p7), [#allocation5], 4294965248  ;;  %679 = vmatprep.subr.bf16.mxu0 %v887_v0  ;;  %655 = vmatprep.subr.bf16.mxu1 %v887_v0  ;;  %v656_v5 = vpack.c.bf16 %v175_v3, %v174_v2  ;;  %v177_v6 = vld [vmem:[#allocation4 + $0x18] sm:$0xff]  ;;  %v178_v8 = vld [vmem:[#allocation4 + $0x20] sm:$0xff]  ;;  %vm191_vm1 = vcmask 64512   ;;  %p170_p6 = scmp.lt.s32.totalorder %s924_s13, 5 }
  0x51   : > { %617 = vmatprep.mubr.msk.f32.mxu0 %vm888_vm0, %v889_v1  ;;  %582 = vmatprep.mubr.msk.f32.mxu1 %vm888_vm0, %v889_v1  ;;  %v659_v7 = vpack.c.bf16 %v177_v6, %v176_v4  ;;  %v179_v9 = vld [vmem:[#allocation4 + $0x28] sm:$0xff]  ;;  %v180_v11 = vld [vmem:[#allocation4 + $0x30] sm:$0xff]  ;;  %v181_v12 = vld [vmem:[#allocation4 + $0x38] sm:$0xff]  ;;  %vm410_vm2 = vcmask 261120  }
  0x52   : > { %681 = vmatpush3.bf16.msra.mxu0 %v656_v5  ;;  %657 = vmatpush3.bf16.msra.mxu1 %v656_v5  ;;  %v662_v10 = vpack.c.bf16 %v179_v9, %v178_v8  ;;  %v190_v13 = vld [vmem:[%s146_s9] sm:$0xff]  ;;  %v665_v14 = vpack.c.bf16 %v181_v12, %v180_v11  ;;  %v182_v15 = vld [vmem:[#allocation4 + $0x40] sm:$0xff]  ;;  %v183_v16 = vld [vmem:[#allocation4 + $0x48] sm:$0xff]  ;;  %s1098_s13 = smov (!%p170_p6, %s924_s13), 5 }
  0x53   : > { %682 = vmatprep.subr.bf16.mxu0 %v887_v0  ;;  %658 = vmatprep.subr.bf16.mxu1 %v887_v0  ;;  %v192_v17 = vsel %vm191_vm1, %v190_v13, 0.0  ;;  %v668_v18 = vpack.c.bf16 %v183_v16, %v182_v15  ;;  %v184_v19 = vld [vmem:[#allocation4 + $0x50] sm:$0xff]  ;;  %v185_v20 = vld [vmem:[#allocation4 + $0x58] sm:$0xff]  ;;  %v186_v23 = vld [vmem:[#allocation4 + $0x60] sm:$0xff]  ;;  %s496_s14 = sshll.u32 %s1098_s13, 3 }
  0x54   : > { %v193_v21 = vpack.c.bf16 %v192_v17, %v192_v17  ;;  %v671_v22 = vpack.c.bf16 %v185_v20, %v184_v19  ;;  %v187_v24 = vld [vmem:[#allocation4 + $0x68] sm:$0xff]  ;;  %v188_v28 = vld [vmem:[#allocation4 + $0x70] sm:$0xff]  ;;  %v189_v29 = vld [vmem:[#allocation4 + $0x78] sm:$0xff]  ;;  %s173_s22 = scalar_lea.vmem %s1081_s2, %s496_s14 }
  0x55   : > { %v674_v27 = vpack.c.bf16 %v187_v24, %v186_v23  ;;  %v677_v31 = vpack.c.bf16 %v189_v29, %v188_v28 }
  0x56   : > { %684 = vmatpush3.bf16.msra.mxu0 %v659_v7  ;;  %660 = vmatpush3.bf16.msra.mxu1 %v659_v7  ;;  %v194_v25 = vunpack.c.l.bf16 %v193_v21 }
  0x57   : > { %685 = vmatprep.subr.bf16.mxu0 %v887_v0  ;;  %661 = vmatprep.subr.bf16.mxu1 %v887_v0 }
  0x58   : > { %v195_v26 = vsub.f32 %v192_v17, %v194_v25 }
  0x5a   : > { %687 = vmatpush3.bf16.msra.mxu0 %v662_v10  ;;  %663 = vmatpush3.bf16.msra.mxu1 %v662_v10  ;;  %v196_v30 = vpack.c.bf16 %v195_v26, %v195_v26 }
  0x5b   : > { %688 = vmatprep.subr.bf16.mxu0 %v887_v0  ;;  %664 = vmatprep.subr.bf16.mxu1 %v887_v0 }
  0x5c   : > { %v197_v32 = vunpack.c.l.bf16 %v196_v30 }
  0x5e   : > { %690 = vmatpush3.bf16.msra.mxu0 %v665_v14  ;;  %666 = vmatpush3.bf16.msra.mxu1 %v665_v14  ;;  %v198_v33 = vsub.f32 %v195_v26, %v197_v32 }
  0x5f   : > { %691 = vmatprep.subr.bf16.mxu0 %v887_v0  ;;  %667 = vmatprep.subr.bf16.mxu1 %v887_v0 }
  0x62   : > { %693 = vmatpush3.bf16.msra.mxu0 %v668_v18  ;;  %669 = vmatpush3.bf16.msra.mxu1 %v668_v18 }
  0x63   : > { %694 = vmatprep.subr.bf16.mxu0 %v887_v0  ;;  %670 = vmatprep.subr.bf16.mxu1 %v887_v0 }
  0x66   : > { %696 = vmatpush3.bf16.msra.mxu0 %v671_v22  ;;  %672 = vmatpush3.bf16.msra.mxu1 %v671_v22 }
  0x67   : > { %697 = vmatprep.subr.bf16.mxu0 %v887_v0  ;;  %673 = vmatprep.subr.bf16.mxu1 %v887_v0 }
  0x6a   : > { %699 = vmatpush3.bf16.msra.mxu0 %v674_v27  ;;  %675 = vmatpush3.bf16.msra.mxu1 %v674_v27 }
  0x6b   : > { %700 = vmatprep.subr.bf16.mxu0 %v887_v0  ;;  %676 = vmatprep.subr.bf16.mxu1 %v887_v0 }
  0x6e   : > { %702 = vmatpush3.bf16.msra.mxu0 %v677_v31  ;;  %678 = vmatpush3.bf16.msra.mxu1 %v677_v31 }
  0x6f   : > { %703 = vmatprep.subr.bf16.mxu0 %v887_v0 }
  0x71   : > { %618 = vmatmul.mubr.f32.vlgmr.msra.gmra.mrb[0].mxu0 %v194_v25  ;;  %583 = vmatmul.mubr.f32.vlgmr.msra.gmra.mrb[0].mxu1 %v197_v32 }
  0x72   : > { %705 = vmatpush3.bf16.msra.mxu0 %v656_v5  ;;  %652 = vmatprep.mubr.msk.f32.mxu0 %vm888_vm0, %v889_v1 }
  0x73   : > { %706 = vmatprep.subr.bf16.mxu0 %v887_v0 }
  0x76   : > { %708 = vmatpush3.bf16.msra.mxu0 %v659_v7 }
  0x77   : > { %709 = vmatprep.subr.bf16.mxu0 %v887_v0 }
  0x7a   : > { %711 = vmatpush3.bf16.msra.mxu0 %v662_v10 }
  0x7b   : > { %712 = vmatprep.subr.bf16.mxu0 %v887_v0 }
  0x7e   : > { %714 = vmatpush3.bf16.msra.mxu0 %v665_v14 }
  0x7f   : > { %715 = vmatprep.subr.bf16.mxu0 %v887_v0 }
  0x82   : > { %717 = vmatpush3.bf16.msra.mxu0 %v668_v18 }
  0x83   : > { %718 = vmatprep.subr.bf16.mxu0 %v887_v0 }
  0x86   : > { %720 = vmatpush3.bf16.msra.mxu0 %v671_v22 }
  0x87   : > { %721 = vmatprep.subr.bf16.mxu0 %v887_v0 }
  0x8a   : > { %723 = vmatpush3.bf16.msra.mxu0 %v674_v27 }
  0x8b   : > { %724 = vmatprep.subr.bf16.mxu0 %v887_v0 }
  0x8e   : > { %726 = vmatpush3.bf16.msra.mxu0 %v677_v31 }
  0x91   : > { %653 = vmatmul.mubr.f32.vlgmr.msra.gmra.mrb[0].mxu0 %v198_v33 }
 0x144   : > { %v265_v34 = vpop.f32.mrb[0].mxu1 }
 0x145   : > { %v584_v35 = vpop.f32.mrb[1].mxu1 }
 0x164   : > { %v405_v36 = vpop.f32.mrb[0].mxu0 }
 0x165   : > { %v727_v37 = vadd.f32 %v405_v36, %v265_v34  ;;  %v654_v38 = vpop.f32.mrb[1].mxu0 }
 0x167   : > { %411 = vst.msk [vmem:[%s173_s22] sm:$0xff] %vm410_vm2, %v727_v37 }
 0x168 PF: > { %p13_p8 = scmp.ge.s32.totalorder %s949_s19, 8   ;;  %s1093_s9 = smov %s873_s10 }
 0x169   : > { %s1094_s10 = smov %s877_s11  ;;  %s1095_s11 = smov %s975_s6 }
 0x16a   : > { %s1096_s12 = smov %s949_s19  ;;  %15 = sbr.rel (!%p13_p8) target bundleno = 4 (0x4), region = 72 }
 0x171   :  { %431 = vsyncpa [#allocation3], 1 }
 0x172   :  { %433 = vsyncpa [#allocation3 + $0x1], 1 }
 0x173   :  { %434 = vsyncpa [#allocation5], 1 }

// kernel: _upsample_pallas.1
= control target key start
LH: loop header
LB: loop body
LE: loop exit
PB: predicated region body
PF: predicated region fallthrough
CT: control target
= control target key end

     0   :  { %7 = vsyncpa [#allocation3], 0  ;;  %s1138_s0 = inlined_call_operand.hbm [shape: f32[128,16], index: 0, kind: input, shape index: {}]   ;;  %s1139_s1 = inlined_call_operand.hbm [shape: f32[128,64], index: 1, kind: input, shape index: {}]   ;;  %s1140_s2 = inlined_call_operand.vmem [shape: f32[128,64], index: 2, kind: output, shape index: {}]  }
   0x1   :  { %9 = vsyncpa [#allocation3 + $0x1], 0 }
   0x2   :  { %10 = vsyncpa [#allocation5], 0  ;;  %s963_s9 = smov 0   ;;  %s965_s10 = smov 0  }
   0x3   :  { %s967_s11 = smov 0   ;;  %s969_s12 = smov 0  }
   0x4 LB: > { %s519_s13 = sadd.s32 4294967295, %s942_s12   ;;  %p36_p0 = scmp.ne.s32.totalorder %s934_s10, %s930_s9  ;;  %s942_s12 = sphi %s969_s12, %s1156_s12   ;;  %s938_s11 = sphi %s967_s11, %s1155_s11   ;;  %s934_s10 = sphi %s965_s10, %s1154_s10   ;;  %s930_s9 = sphi %s963_s9, %s1153_s9  }
   0x5   : > { %p985_p1 = scmp.eq.s32.totalorder %s519_s13, 0  ;;  %p521_p2 = scmp.ge.s32.totalorder %s942_s12, 1 }
   0x6   : > { %p94_p3 = scmp.lt.s32.totalorder %s942_s12, 9  ;;  %s944_s17 = smov [#allocation4]  }
   0x7   : > { %s1145_s14 = scalar_select %p985_p1, 1, 0 }
   0x8   : > { %p993_p4 = por %p985_p1, %p36_p0  ;;  %p997_p5 = pnand %p521_p2, %p94_p3 }
   0x9   : > { %s106_s18 = sshll.u32 %s944_s17, 4  ;;  %s1010_s20 = sadd.s32 1, %s942_s12   ;;  %s107_s18 = int_to_ptr.vmem [resolvable:$true] %s106_s18 }
   0xa   : > { %s1146_s15 = scalar_select %p993_p4, 1, 0 }
   0xb   : > { %s1147_s16 = scalar_select %p997_p5, 1, 0 }
   0xc   : > { %p800_p6 = pneg %p997_p5  ;;  %s23_s21 = sadd.s32 1, %s938_s11 }
   0xd   : > { %s20_s22 = ssub.s32 %s942_s12, %s1010_s20  ;;  %s846_s25 = scalar_lea.hbm %s1139_s1, 2048 }
   0xe   : > { %p1005_p7 = pnand %p800_p6, %p985_p1  ;;  %p847_p8 = scmp.ne.s32.totalorder %s1139_s1, %s846_s25 }
   0xf   : > { %p853_p12 = scmp.lt.u32.totalorder %s846_s25, %s1139_s1 }
  0x10   : > { %p848_p9 = pneg %p1005_p7 }
  0x12   : > { %p849_p10 = pnand %p848_p9, %p847_p8 }
  0x14   : > { %p850_p11 = pneg %p849_p10 }
  0x16   : > { %p855_p13 = pnand %p853_p12, %p850_p11 }
  0x18   : > { %858 = shalt.err (!%p855_p13)
}
  0x19   : > { %s859_s30 = scalar_lea.vmem %s107_s18, 2048  ;;  %p867_p6 = scmp.lt.s32.totalorder %s107_s18, %s107_s18 }
  0x1a   : > { %p860_p0 = scmp.ne.s32.totalorder %s107_s18, %s859_s30  ;;  %p868_p1 = scmp.lt.s32.totalorder %s859_s30, %s859_s30 }
  0x1c   : > { %p862_p2 = pnand %p860_p0, %p848_p9  ;;  %p869_p4 = por %p868_p1, %p867_p6 }
  0x1e   : > { %p863_p3 = pneg %p862_p2 }
  0x20   : > { %p870_p5 = pnand %p869_p4, %p863_p3 }
  0x22   : > { %873 = shalt.err (!%p870_p5)
}
  0x23   : > { %s945_s3 = smov 128   ;;  %s946_s4 = smov 8  }
  0x24   : > { %803 = dma.hbm_to_vmem [thread:$0]  (!%p1005_p7), %s1139_s1, 2048, %s107_s18, [#allocation5], %s945_s3, %s945_s3, %s946_s4  }
  0x25   : > { %p21_p1 = scmp.eq.s32.totalorder %s20_s22, 0  ;;  %p30_p4 = scmp.ne.s32.totalorder %s938_s11, %s934_s10 }
  0x26   : > { %p31_p5 = scmp.eq.s32.totalorder %s942_s12, 0  ;;  %p809_p8 = scmp.lt.s32.totalorder %s942_s12, 8 }
  0x27   : > { %s1039_s7 = scalar_select %p21_p1, %s938_s11, %s23_s21  }
  0x28   : > { %p32_p9 = por %p31_p5, %p30_p4  ;;  %s120_s8 = sand.u32 1, %s938_s11  }
  0x29   : > { %s524_s9 = sshll.u32 %s120_s8, 4  ;;  %s534_s17 = sshll.u32 %s942_s12, 8 }
  0x2a   : > { %s1046_s19 = scalar_lea.hbm %s1138_s0, %s534_s17  ;;  %s124_s18 = scalar_lea.vmem [#allocation2], %s524_s9 }
  0x2b   : > { %s131_s22 = sshll.u32 %s124_s18, 4  ;;  %p1050_p7 = pnand %p809_p8, %p32_p9  ;;  %s1048_s22 = int_to_ptr.vmem [resolvable:$true] %s131_s22 }
  0x2c   : > { %s1054_s25 = scalar_lea.sflag [#allocation3], %s120_s8  ;;  %s874_s26 = scalar_lea.hbm %s1046_s19, 256 }
  0x2d   : > { %p875_p10 = scmp.ne.s32.totalorder %s1046_s19, %s874_s26  ;;  %p876_p11 = pneg %p1050_p7 }
  0x2e   : > { %s879_s29 = scalar_lea.hbm %s1138_s0, 2048  ;;  %p880_p0 = scmp.lt.u32.totalorder %s1046_s19, %s1138_s0 }
  0x2f   : > { %p877_p12 = pnand %p876_p11, %p875_p10  ;;  %p881_p2 = scmp.lt.u32.totalorder %s879_s29, %s874_s26 }
  0x30   : > { %p883_p6 = scmp.lt.u32.totalorder %s874_s26, %s1046_s19 }
  0x31   : > { %p878_p13 = pneg %p877_p12  ;;  %p882_p3 = por %p881_p2, %p880_p0 }
  0x33   : > { %p884_p1 = por %p883_p6, %p882_p3 }
  0x35   : > { %p885_p4 = pnand %p884_p1, %p878_p13 }
  0x37   : > { %888 = shalt.err (!%p885_p4)
}
  0x38   : > { %s889_s6 = scalar_lea.vmem %s1048_s22, 256  ;;  %s947_s8 = smov [#allocation2]  }
  0x39   : > { %p890_p5 = scmp.ne.s32.totalorder %s1048_s22, %s889_s6  ;;  %s894_s9 = sshll.u32 %s947_s8, 4  ;;  %s895_s9 = int_to_ptr.vmem [resolvable:$false] %s894_s9 }
  0x3a   : > { %s896_s17 = scalar_lea.vmem %s895_s9, 512  ;;  %p897_p10 = scmp.lt.s32.totalorder %s1048_s22, %s895_s9 }
  0x3b   : > { %p892_p8 = pnand %p890_p5, %p876_p11  ;;  %p898_p12 = scmp.lt.s32.totalorder %s896_s17, %s889_s6 }
  0x3d   : > { %p893_p9 = pneg %p892_p8  ;;  %p899_p0 = por %p898_p12, %p897_p10 }
  0x3f   : > { %p900_p2 = pnand %p899_p0, %p893_p9 }
  0x41   : > { %903 = shalt.err (!%p900_p2)
}
  0x42   : > { %807 = dma.hbm_to_vmem [thread:$0]  (!%p1050_p7), %s1046_s19, 256, %s1048_s22, %s1054_s25, %s945_s3, %s945_s3, %s946_s4  }
  0x43   : > { %p1150_p11 = scmp.ne.s32.totalorder %s1147_s16, 0 }
  0x44   : > { %s145_s23 = sand.u32 (!%p1150_p11), 1, %s934_s10   ;;  %p1151_p13 = scmp.ne.s32.totalorder (!%p1150_p11), %s1146_s15, 0 }
  0x45   : > { %143 = sbr.rel (%p1150_p11) target bundleno = 363 (0x16b), region = 28  ;;  %s528_s24 = sshll.u32 (!%p1150_p11), %s145_s23, 4 }
  0x46   : > { %s146_s18 = scalar_lea.sflag (!%p1150_p11), [#allocation3], %s145_s23  ;;  %s149_s26 = scalar_lea.vmem (!%p1150_p11), [#allocation2], %s528_s24 }
  0x4c   : > { %921 = dma.done.wait (%p1151_p13), %s146_s18, 256  }
  0x4d   : > { %923 = vsyncadd (%p1151_p13), %s146_s18, 4294967040  ;;  %p1152_p3 = scmp.ne.s32.totalorder %s1145_s14, 0 }
  0x4f   : > { %925 = dma.done.wait (%p1152_p3), [#allocation5], 2048  }
  0x50   : > { %927 = vsyncadd (%p1152_p3), [#allocation5], 4294965248  ;;  %v181_v0 = vld [vmem:[#allocation4] sm:$0xff]  ;;  %v182_v1 = vld [vmem:[#allocation4 + $0x8] sm:$0xff]  ;;  %vm199_vm0 = vcmask 130048   ;;  %s530_s14 = sshll.u32 %s519_s13, 1 }
  0x51   : > { %v183_v2 = vld [vmem:[#allocation4 + $0x10] sm:$0xff]  ;;  %v1096_v3 = vpack.c.bf16 %v182_v1, %v181_v0  ;;  %v184_v4 = vld [vmem:[#allocation4 + $0x18] sm:$0xff]  ;;  %v185_v6 = vld [vmem:[#allocation4 + $0x20] sm:$0xff]  ;;  %p176_p7 = scmp.lt.s32.totalorder %s530_s14, 15  ;;  %vm439_vm1 = vcmask 523264  }
  0x52   : > { %v1098_v5 = vpack.c.bf16 %v184_v4, %v183_v2  ;;  %v186_v7 = vld [vmem:[#allocation4 + $0x28] sm:$0xff]  ;;  %v197_v9 = vld [vmem:[%s149_s26] sm:$0xff]  ;;  %v188_v12 = vld [vmem:[#allocation4 + $0x38] sm:$0xff] }
  0x53   : > { %727 = vmatprep.subr.bf16.mxu0 %v1096_v3  ;;  %695 = vmatprep.subr.bf16.mxu1 %v1096_v3  ;;  %v1105_v8 = vpack.c.bf16 %v186_v7, %v185_v6  ;;  %v198_v10 = vld [vmem:[%s149_s26 + $0x8] sm:$0xff]  ;;  %v187_v11 = vld [vmem:[#allocation4 + $0x30] sm:$0xff]  ;;  %v200_v13 = vsel %vm199_vm0, %v197_v9, 0.0  ;;  %v189_v19 = vld [vmem:[#allocation4 + $0x40] sm:$0xff]  ;;  %s1158_s14 = smov (!%p176_p7, %s530_s14), 15 }
  0x54   : > { %729 = vmatpush3.bf16.msra.mxu0 %v1096_v3  ;;  %697 = vmatpush3.bf16.msra.mxu1 %v1096_v3  ;;  %v201_v14 = vsel %vm199_vm0, %v198_v10, 0.0  ;;  %v706_v16 = vpack.c.bf16 %v188_v12, %v187_v11  ;;  %v190_v20 = vld [vmem:[#allocation4 + $0x48] sm:$0xff]  ;;  %v191_v25 = vld [vmem:[#allocation4 + $0x50] sm:$0xff]  ;;  %v192_v26 = vld [vmem:[#allocation4 + $0x58] sm:$0xff]  ;;  %s531_s15 = sshll.u32 %s1158_s14, 3 }
  0x55   : > { %731 = vmatprep.subr.bf16.mxu0 %v1098_v5  ;;  %699 = vmatprep.subr.bf16.mxu1 %v1098_v5  ;;  %v202_v15 = vpack.c.bf16 %v201_v14, %v200_v13  ;;  %v710_v23 = vpack.c.bf16 %v190_v20, %v189_v19  ;;  %v714_v28 = vpack.c.bf16 %v192_v26, %v191_v25  ;;  %v193_v29 = vld [vmem:[#allocation4 + $0x60] sm:$0xff]  ;;  %v194_v30 = vld [vmem:[#allocation4 + $0x68] sm:$0xff]  ;;  %v195_v32 = vld [vmem:[#allocation4 + $0x70] sm:$0xff]  ;;  %s179_s4 = scalar_lea.vmem %s1140_s2, %s531_s15 }
  0x56   : > { %v718_v31 = vpack.c.bf16 %v194_v30, %v193_v29  ;;  %v196_v33 = vld [vmem:[#allocation4 + $0x78] sm:$0xff] }
  0x57   : > { %v203_v17 = vunpack.c.l.bf16 %v202_v15  ;;  %v204_v18 = vunpack.c.h.bf16 %v202_v15  ;;  %v722_v34 = vpack.c.bf16 %v196_v33, %v195_v32 }
  0x58   : > { %733 = vmatpush3.bf16.msra.mxu0 %v1098_v5  ;;  %701 = vmatpush3.bf16.msra.mxu1 %v1098_v5 }
  0x59   : > { %735 = vmatprep.subr.bf16.mxu0 %v1105_v8  ;;  %703 = vmatprep.subr.bf16.mxu1 %v1105_v8  ;;  %v205_v21 = vsub.f32 %v200_v13, %v203_v17  ;;  %v206_v22 = vsub.f32 %v201_v14, %v204_v18 }
  0x5a   : > { %656 = vmatprep.mubr.f32.mxu0 %v203_v17 }
  0x5b   : > { %v207_v24 = vpack.c.bf16 %v206_v22, %v205_v21 }
  0x5c   : > { %737 = vmatpush3.bf16.msra.mxu0 %v1105_v8  ;;  %705 = vmatpush3.bf16.msra.mxu1 %v1105_v8 }
  0x5d   : > { %739 = vmatprep.subr.bf16.mxu0 %v706_v16  ;;  %707 = vmatprep.subr.bf16.mxu1 %v706_v16  ;;  %v208_v27 = vunpack.c.l.bf16 %v207_v24  ;;  %v209_v35 = vunpack.c.h.bf16 %v207_v24 }
  0x5f   : > { %621 = vmatprep.mubr.f32.mxu1 %v208_v27  ;;  %v210_v36 = vsub.f32 %v205_v21, %v208_v27  ;;  %v211_v37 = vsub.f32 %v206_v22, %v209_v35 }
  0x60   : > { %741 = vmatpush3.bf16.msra.mxu0 %v706_v16  ;;  %709 = vmatpush3.bf16.msra.mxu1 %v706_v16 }
  0x61   : > { %743 = vmatprep.subr.bf16.mxu0 %v710_v23  ;;  %711 = vmatprep.subr.bf16.mxu1 %v710_v23 }
  0x64   : > { %745 = vmatpush3.bf16.msra.mxu0 %v710_v23  ;;  %713 = vmatpush3.bf16.msra.mxu1 %v710_v23 }
  0x65   : > { %747 = vmatprep.subr.bf16.mxu0 %v714_v28  ;;  %715 = vmatprep.subr.bf16.mxu1 %v714_v28 }
  0x68   : > { %749 = vmatpush3.bf16.msra.mxu0 %v714_v28  ;;  %717 = vmatpush3.bf16.msra.mxu1 %v714_v28 }
  0x69   : > { %751 = vmatprep.subr.bf16.mxu0 %v718_v31  ;;  %719 = vmatprep.subr.bf16.mxu1 %v718_v31 }
  0x6c   : > { %753 = vmatpush3.bf16.msra.mxu0 %v718_v31  ;;  %721 = vmatpush3.bf16.msra.mxu1 %v718_v31 }
  0x6d   : > { %755 = vmatprep.subr.bf16.mxu0 %v722_v34  ;;  %723 = vmatprep.subr.bf16.mxu1 %v722_v34 }
  0x70   : > { %757 = vmatpush3.bf16.msra.mxu0 %v722_v34  ;;  %725 = vmatpush3.bf16.msra.mxu1 %v722_v34 }
  0x71   : > { %759 = vmatprep.subr.bf16.mxu0 %v1096_v3 }
  0x73   : > { %657 = vmatmul.mubr.f32.vlgmr.msra.gmra.mrb[0].mxu0 %v204_v18  ;;  %622 = vmatmul.mubr.f32.vlgmr.msra.gmra.mrb[0].mxu1 %v209_v35 }
  0x74   : > { %761 = vmatpush3.bf16.msra.mxu0 %v1096_v3  ;;  %691 = vmatprep.mubr.f32.mxu0 %v210_v36 }
  0x75   : > { %763 = vmatprep.subr.bf16.mxu0 %v1098_v5 }
  0x78   : > { %765 = vmatpush3.bf16.msra.mxu0 %v1098_v5 }
  0x79   : > { %767 = vmatprep.subr.bf16.mxu0 %v1105_v8 }
  0x7c   : > { %769 = vmatpush3.bf16.msra.mxu0 %v1105_v8 }
  0x7d   : > { %771 = vmatprep.subr.bf16.mxu0 %v706_v16 }
  0x80   : > { %773 = vmatpush3.bf16.msra.mxu0 %v706_v16 }
  0x81   : > { %775 = vmatprep.subr.bf16.mxu0 %v710_v23 }
  0x84   : > { %777 = vmatpush3.bf16.msra.mxu0 %v710_v23 }
  0x85   : > { %779 = vmatprep.subr.bf16.mxu0 %v714_v28 }
  0x88   : > { %781 = vmatpush3.bf16.msra.mxu0 %v714_v28 }
  0x89   : > { %783 = vmatprep.subr.bf16.mxu0 %v718_v31 }
  0x8c   : > { %785 = vmatpush3.bf16.msra.mxu0 %v718_v31 }
  0x8d   : > { %787 = vmatprep.subr.bf16.mxu0 %v722_v34 }
  0x90   : > { %789 = vmatpush3.bf16.msra.mxu0 %v722_v34 }
  0x93   : > { %692 = vmatmul.mubr.f32.vlgmr.msra.gmra.mrb[0].mxu0 %v211_v37 }
 0x146   : > { %v623_v38 = vpop.f32.mrb[0].mxu1 }
 0x147   : > { %v278_v39 = vpop.f32.mrb[1].mxu1 }
 0x166   : > { %v693_v40 = vpop.f32.mrb[0].mxu0 }
 0x167   : > { %v790_v41 = vadd.f32 %v693_v40, %v623_v38  ;;  %v428_v42 = vpop.f32.mrb[1].mxu0 }
 0x168   : > { %v791_v43 = vadd.f32 %v428_v42, %v278_v39 }
 0x169   : > { %441 = vst.msk [vmem:[%s179_s4 + $0x8] sm:$0xff] %vm439_vm1, %v790_v41 }
 0x16a   : > { %440 = vst.msk [vmem:[%s179_s4] sm:$0xff] %vm439_vm1, %v791_v43 }
 0x16b PF: > { %p13_p6 = scmp.ge.s32.totalorder %s1010_s20, 10   ;;  %s1153_s9 = smov %s934_s10 }
 0x16c   : > { %s1154_s10 = smov %s938_s11  ;;  %s1155_s11 = smov %s1039_s7 }
 0x16d   : > { %s1156_s12 = smov %s1010_s20  ;;  %15 = sbr.rel (!%p13_p6) target bundleno = 4 (0x4), region = 72 }
 0x174   :  { %464 = vsyncpa [#allocation3], 1 }
 0x175   :  { %466 = vsyncpa [#allocation3 + $0x1], 1 }
 0x176   :  { %467 = vsyncpa [#allocation5], 1 }

</bundles_post_ra>
